<compile_context>
chip_gen: v5e
topology: v5e:2x2
jax: 0.10.0
libtpu: 0.0.40
codegen_flags: <defaults>
</compile_context>

<pallas_src>
import functools
import math

import jax
import jax.numpy as jnp
from jax.experimental import pallas as pl
from jax.experimental.pallas import tpu as pltpu


# -----------------------------------------------------------------------------
# Fused MHA kernel: one grid step == one batch element, everything stays in
# VMEM/vregs between the q/k/v projections, per-head SDPA and the final ff
# projection.
# -----------------------------------------------------------------------------
def _mha_fused_kernel(q_ref, k_ref, v_ref, wq_ref, wk_ref, wv_ref, wo_ref,
                      o_ref, *, num_heads, scale_inv):
    f32 = jnp.float32
    cdt = jnp.bfloat16  # MXU operand dtype; accumulation stays in f32

    xq = q_ref[0].astype(cdt)          # (S, E)
    xk = k_ref[0].astype(cdt)
    xv = v_ref[0].astype(cdt)
    wq = wq_ref[...].astype(cdt)       # (E, Dk)
    wk = wk_ref[...].astype(cdt)       # (E, Dk)
    wv = wv_ref[...].astype(cdt)       # (E, Dv)
    wo = wo_ref[...]                   # (Dv, E) f32; sliced per head below

    # Lane-dense projections (last dim = Dk / Dv = H*dh, not dh).
    # Fold 1/sqrt(Dk) into q here: O(S*Dk) multiply instead of O(S*S) divide.
    q = jnp.dot(xq, wq, preferred_element_type=f32) * scale_inv   # (S, Dk) f32
    k = jnp.dot(xk, wk, preferred_element_type=f32)               # (S, Dk) f32
    v = jnp.dot(xv, wv, preferred_element_type=f32)               # (S, Dv) f32

    S, Dk = q.shape
    Dv = v.shape[1]
    E = o_ref.shape[-1]
    dk_h = Dk // num_heads
    dv_h = Dv // num_heads

    # Contract the last dims of q and k directly (no explicit k.T / XLU transpose).
    nt_dims = (((1,), (1,)), ((), ()))

    acc = jnp.zeros((S, E), dtype=f32)
    for h in range(num_heads):                             # static unroll, tiny H
        qh = q[:, h * dk_h:(h + 1) * dk_h].astype(cdt)     # (S, dk_h)
        kh = k[:, h * dk_h:(h + 1) * dk_h].astype(cdt)     # (S, dk_h)
        vh = v[:, h * dv_h:(h + 1) * dv_h].astype(cdt)     # (S, dv_h)

        s = jax.lax.dot_general(qh, kh, nt_dims,
                                preferred_element_type=f32)        # (S, S) f32
        # TODO(synk): optional boolean mask (masked_fill -> -1e9) would go here.
        s = s - jnp.max(s, axis=-1, keepdims=True)                 # stable softmax
        p = jnp.exp(s)
        p = p * pl.reciprocal(jnp.sum(p, axis=-1, keepdims=True), approx=True)

        oh = jnp.dot(p.astype(cdt), vh, preferred_element_type=f32)   # (S, dv_h)

        # merged_heads @ Wo expressed as accumulated per-head partial products:
        #   out = sum_h  oh @ Wo[h*dv_h:(h+1)*dv_h, :]
        wo_h = wo[h * dv_h:(h + 1) * dv_h, :].astype(cdt)             # (dv_h, E)
        acc = acc + jnp.dot(oh.astype(cdt), wo_h, preferred_element_type=f32)

    o_ref[0] = acc                                   # (S, E) f32, lane-dense store


# -----------------------------------------------------------------------------
# Wrapper: single pallas_call for the whole MHA forward.
# -----------------------------------------------------------------------------
def multi_head_attention(query, key, value, params, *, num_heads):
    """query/key/value: (B, S, E) float32 -> (B, S, E) float32."""
    Wq, Wk, Wv, Wo = params["Wq"], params["Wk"], params["Wv"], params["Wo"]
    B, S, E = query.shape
    Dk = Wq.shape[1]
    Dv = Wv.shape[1]
    assert Dk % num_heads == 0 and Dv % num_heads == 0

    kernel = functools.partial(
        _mha_fused_kernel,
        num_heads=num_heads,
        # NOTE: reference module scales by sqrt(total query_key_dim), not per-head.
        scale_inv=1.0 / math.sqrt(float(Dk)),
    )

    grid_spec = pl.GridSpec(
        grid=(B,),
        in_specs=[
            pl.BlockSpec((1, S, E), lambda b: (b, 0, 0)),   # query
            pl.BlockSpec((1, S, E), lambda b: (b, 0, 0)),   # key
            pl.BlockSpec((1, S, E), lambda b: (b, 0, 0)),   # value
            # weights: constant block index -> stay resident in VMEM across steps
            pl.BlockSpec((E, Dk), lambda b: (0, 0)),        # Wq
            pl.BlockSpec((E, Dk), lambda b: (0, 0)),        # Wk
            pl.BlockSpec((E, Dv), lambda b: (0, 0)),        # Wv
            pl.BlockSpec((Dv, E), lambda b: (0, 0)),        # Wo
        ],
        out_specs=pl.BlockSpec((1, S, E), lambda b: (b, 0, 0)),
    )

    return pl.pallas_call(
        kernel,
        out_shape=jax.ShapeDtypeStruct((B, S, E), jnp.float32),
        grid_spec=grid_spec,
        compiler_params=pltpu.CompilerParams(
            dimension_semantics=("parallel",),   # batch axis feeds both v7x TCs
        ),
    )(query, key, value, Wq, Wk, Wv, Wo)


# -----------------------------------------------------------------------------
# Plain-JAX (pure f32) reference for verification.
# -----------------------------------------------------------------------------
def reference_mha(query, key, value, params, *, num_heads):
    Wq, Wk, Wv, Wo = params["Wq"], params["Wk"], params["Wv"], params["Wo"]
    B, S, E = query.shape
    Dk = Wq.shape[1]
    Dv = Wv.shape[1]
    dk_h = Dk // num_heads
    dv_h = Dv // num_heads

    qp = (query @ Wq).reshape(B, S, num_heads, dk_h).transpose(0, 2, 1, 3)
    kp = (key @ Wk).reshape(B, S, num_heads, dk_h).transpose(0, 2, 1, 3)
    vp = (value @ Wv).reshape(B, S, num_heads, dv_h).transpose(0, 2, 1, 3)

    scores = jnp.einsum("bhqd,bhkd->bhqk", qp, kp) / math.sqrt(float(Dk))
    p = jax.nn.softmax(scores, axis=-1)
    x = jnp.einsum("bhqk,bhkd->bhqd", p, vp)
    x = x.transpose(0, 2, 1, 3).reshape(B, S, Dv)
    return x @ Wo


if __name__ == "__main__":
    # small shapes consistent with the module
    B, S, E = 2, 8, 32          # batch, seq_length, embedding_dim
    Dk, Dv, H = 32, 32, 4       # query_key_dim, value_dim, num_heads

    key0 = jax.random.PRNGKey(0)
    k1, k2, k3, k4, k5, k6, k7 = jax.random.split(key0, 7)

    # deterministic parameter init (stored as (in, out))
    params = {
        "Wq": jax.random.normal(k1, (E, Dk), dtype=jnp.float32) * (1.0 / math.sqrt(E)),
        "Wk": jax.random.normal(k2, (E, Dk), dtype=jnp.float32) * (1.0 / math.sqrt(E)),
        "Wv": jax.random.normal(k3, (E, Dv), dtype=jnp.float32) * (1.0 / math.sqrt(E)),
        "Wo": jax.random.normal(k4, (Dv, E), dtype=jnp.float32) * (1.0 / math.sqrt(Dv)),
    }

    query = jax.random.normal(k5, (B, S, E), dtype=jnp.float32)
    key_in = jax.random.normal(k6, (B, S, E), dtype=jnp.float32)
    value = jax.random.normal(k7, (B, S, E), dtype=jnp.float32)

    out = multi_head_attention(query, key_in, value, params, num_heads=H)
    out = jax.block_until_ready(out)

    ref = reference_mha(query, key_in, value, params, num_heads=H)
    assert out.shape == (B, S, E)
    # tolerance accounts for bf16 MXU operands (f32 accumulation) + approx reciprocal
    assert jnp.allclose(out, ref, atol=2e-2, rtol=2e-2), "mismatch vs reference"

    print("KERNEL_OK")
</pallas_src>

<mosaic_0001>
module attributes {stable_mosaic.version = 11 : i64} {
  func.func @_mha_fused_kernel(%arg0: i32, %arg1: memref<1x8x32xf32, #tpu.memory_space<vmem>>, %arg2: memref<1x8x32xf32, #tpu.memory_space<vmem>>, %arg3: memref<1x8x32xf32, #tpu.memory_space<vmem>>, %arg4: memref<32x32xf32, #tpu.memory_space<vmem>>, %arg5: memref<32x32xf32, #tpu.memory_space<vmem>>, %arg6: memref<32x32xf32, #tpu.memory_space<vmem>>, %arg7: memref<32x32xf32, #tpu.memory_space<vmem>>, %arg8: memref<1x8x32xf32, #tpu.memory_space<vmem>>) attributes {dimension_semantics = [#tpu.dimension_semantics<parallel>], iteration_bounds = array<i64: 2>, scalar_prefetch = 0 : i64, scratch_operands = 0 : i64, tpu.core_type = #tpu.core_type<tc>, window_params = [{transform_indices = @transform_0, window_bounds = array<i64: 1, 8, 32>}, {transform_indices = @transform_1, window_bounds = array<i64: 1, 8, 32>}, {transform_indices = @transform_2, window_bounds = array<i64: 1, 8, 32>}, {pipeline_mode = #tpu.pipeline_mode<synchronous>, transform_indices = @transform_3, window_bounds = array<i64: 32, 32>}, {pipeline_mode = #tpu.pipeline_mode<synchronous>, transform_indices = @transform_4, window_bounds = array<i64: 32, 32>}, {pipeline_mode = #tpu.pipeline_mode<synchronous>, transform_indices = @transform_5, window_bounds = array<i64: 32, 32>}, {pipeline_mode = #tpu.pipeline_mode<synchronous>, transform_indices = @transform_6, window_bounds = array<i64: 32, 32>}, {transform_indices = @transform_7, window_bounds = array<i64: 1, 8, 32>}]} {
    %c0 = arith.constant 0 : index
    %c0_0 = arith.constant 0 : index
    %c0_1 = arith.constant 0 : index
    %0 = vector.load %arg1[%c0, %c0_0, %c0_1] : memref<1x8x32xf32, #tpu.memory_space<vmem>>, vector<1x8x32xf32>
    %1 = vector.shape_cast %0 : vector<1x8x32xf32> to vector<8x32xf32>
    %2 = arith.truncf %1 : vector<8x32xf32> to vector<8x32xbf16>
    %c0_2 = arith.constant 0 : index
    %c0_3 = arith.constant 0 : index
    %c0_4 = arith.constant 0 : index
    %3 = vector.load %arg2[%c0_2, %c0_3, %c0_4] : memref<1x8x32xf32, #tpu.memory_space<vmem>>, vector<1x8x32xf32>
    %4 = vector.shape_cast %3 : vector<1x8x32xf32> to vector<8x32xf32>
    %5 = arith.truncf %4 : vector<8x32xf32> to vector<8x32xbf16>
    %c0_5 = arith.constant 0 : index
    %c0_6 = arith.constant 0 : index
    %c0_7 = arith.constant 0 : index
    %6 = vector.load %arg3[%c0_5, %c0_6, %c0_7] : memref<1x8x32xf32, #tpu.memory_space<vmem>>, vector<1x8x32xf32>
    %7 = vector.shape_cast %6 : vector<1x8x32xf32> to vector<8x32xf32>
    %8 = arith.truncf %7 : vector<8x32xf32> to vector<8x32xbf16>
    %c0_8 = arith.constant 0 : index
    %c0_9 = arith.constant 0 : index
    %9 = vector.load %arg4[%c0_8, %c0_9] : memref<32x32xf32, #tpu.memory_space<vmem>>, vector<32x32xf32>
    %10 = arith.truncf %9 : vector<32x32xf32> to vector<32x32xbf16>
    %c0_10 = arith.constant 0 : index
    %c0_11 = arith.constant 0 : index
    %11 = vector.load %arg5[%c0_10, %c0_11] : memref<32x32xf32, #tpu.memory_space<vmem>>, vector<32x32xf32>
    %12 = arith.truncf %11 : vector<32x32xf32> to vector<32x32xbf16>
    %c0_12 = arith.constant 0 : index
    %c0_13 = arith.constant 0 : index
    %13 = vector.load %arg6[%c0_12, %c0_13] : memref<32x32xf32, #tpu.memory_space<vmem>>, vector<32x32xf32>
    %14 = arith.truncf %13 : vector<32x32xf32> to vector<32x32xbf16>
    %c0_14 = arith.constant 0 : index
    %c0_15 = arith.constant 0 : index
    %15 = vector.load %arg7[%c0_14, %c0_15] : memref<32x32xf32, #tpu.memory_space<vmem>>, vector<32x32xf32>
    %cst = arith.constant dense<0.000000e+00> : vector<8x32xf32>
    %16 = tpu.matmul %2, %10, %cst {dimension_numbers = #tpu.dot_dimension_numbers<[1], [0], [0], [1], [0, 0, 1, 1], [], []>} : vector<8x32xbf16>, vector<32x32xbf16>, vector<8x32xf32> -> vector<8x32xf32>
    %cst_16 = arith.constant 0.176776692 : f32
    %17 = vector.broadcast %cst_16 : f32 to vector<8x32xf32>
    %18 = arith.mulf %16, %17 : vector<8x32xf32>
    %cst_17 = arith.constant dense<0.000000e+00> : vector<8x32xf32>
    %19 = tpu.matmul %5, %12, %cst_17 {dimension_numbers = #tpu.dot_dimension_numbers<[1], [0], [0], [1], [0, 0, 1, 1], [], []>} : vector<8x32xbf16>, vector<32x32xbf16>, vector<8x32xf32> -> vector<8x32xf32>
    %cst_18 = arith.constant dense<0.000000e+00> : vector<8x32xf32>
    %20 = tpu.matmul %8, %14, %cst_18 {dimension_numbers = #tpu.dot_dimension_numbers<[1], [0], [0], [1], [0, 0, 1, 1], [], []>} : vector<8x32xbf16>, vector<32x32xbf16>, vector<8x32xf32> -> vector<8x32xf32>
    %cst_19 = arith.constant 0.000000e+00 : f32
    %21 = vector.broadcast %cst_19 : f32 to vector<8x32xf32>
    %22 = vector.extract_strided_slice %18 {offsets = [0, 0], sizes = [8, 8], strides = [1, 1]} : vector<8x32xf32> to vector<8x8xf32>
    %23 = arith.truncf %22 : vector<8x8xf32> to vector<8x8xbf16>
    %24 = vector.extract_strided_slice %19 {offsets = [0, 0], sizes = [8, 8], strides = [1, 1]} : vector<8x32xf32> to vector<8x8xf32>
    %25 = arith.truncf %24 : vector<8x8xf32> to vector<8x8xbf16>
    %26 = vector.extract_strided_slice %20 {offsets = [0, 0], sizes = [8, 8], strides = [1, 1]} : vector<8x32xf32> to vector<8x8xf32>
    %27 = arith.truncf %26 : vector<8x8xf32> to vector<8x8xbf16>
    %cst_20 = arith.constant dense<0.000000e+00> : vector<8x8xf32>
    %28 = tpu.matmul %23, %25, %cst_20 {dimension_numbers = #tpu.dot_dimension_numbers<[1], [1], [0], [0], [0, 0, 1, 0], [], []>} : vector<8x8xbf16>, vector<8x8xbf16>, vector<8x8xf32> -> vector<8x8xf32>
    %cst_21 = arith.constant dense<0xFF800000> : vector<8xf32>
    %29 = vector.multi_reduction <maximumf>, %28, %cst_21 [1] : vector<8x8xf32> to vector<8xf32>
    %30 = vector.shape_cast %29 : vector<8xf32> to vector<8x1xf32>
    %31 = vector.broadcast %30 : vector<8x1xf32> to vector<8x8xf32>
    %32 = arith.subf %28, %31 : vector<8x8xf32>
    %33 = math.exp %32 : vector<8x8xf32>
    %cst_22 = arith.constant dense<0.000000e+00> : vector<8xf32>
    %34 = vector.multi_reduction <add>, %33, %cst_22 [1] : vector<8x8xf32> to vector<8xf32>
    %35 = vector.shape_cast %34 : vector<8xf32> to vector<8x1xf32>
    %36 = tpu.reciprocal %35 {approx = true} : vector<8x1xf32> -> vector<8x1xf32>
    %37 = vector.broadcast %36 : vector<8x1xf32> to vector<8x8xf32>
    %38 = arith.mulf %33, %37 : vector<8x8xf32>
    %39 = arith.truncf %38 : vector<8x8xf32> to vector<8x8xbf16>
    %cst_23 = arith.constant dense<0.000000e+00> : vector<8x8xf32>
    %40 = tpu.matmul %39, %27, %cst_23 {dimension_numbers = #tpu.dot_dimension_numbers<[1], [0], [0], [1], [0, 0, 1, 1], [], []>} : vector<8x8xbf16>, vector<8x8xbf16>, vector<8x8xf32> -> vector<8x8xf32>
    %41 = vector.extract_strided_slice %15 {offsets = [0, 0], sizes = [8, 32], strides = [1, 1]} : vector<32x32xf32> to vector<8x32xf32>
    %42 = arith.truncf %41 : vector<8x32xf32> to vector<8x32xbf16>
    %43 = arith.truncf %40 : vector<8x8xf32> to vector<8x8xbf16>
    %cst_24 = arith.constant dense<0.000000e+00> : vector<8x32xf32>
    %44 = tpu.matmul %43, %42, %cst_24 {dimension_numbers = #tpu.dot_dimension_numbers<[1], [0], [0], [1], [0, 0, 1, 1], [], []>} : vector<8x8xbf16>, vector<8x32xbf16>, vector<8x32xf32> -> vector<8x32xf32>
    %45 = arith.addf %21, %44 : vector<8x32xf32>
    %46 = vector.extract_strided_slice %18 {offsets = [0, 8], sizes = [8, 8], strides = [1, 1]} : vector<8x32xf32> to vector<8x8xf32>
    %47 = arith.truncf %46 : vector<8x8xf32> to vector<8x8xbf16>
    %48 = vector.extract_strided_slice %19 {offsets = [0, 8], sizes = [8, 8], strides = [1, 1]} : vector<8x32xf32> to vector<8x8xf32>
    %49 = arith.truncf %48 : vector<8x8xf32> to vector<8x8xbf16>
    %50 = vector.extract_strided_slice %20 {offsets = [0, 8], sizes = [8, 8], strides = [1, 1]} : vector<8x32xf32> to vector<8x8xf32>
    %51 = arith.truncf %50 : vector<8x8xf32> to vector<8x8xbf16>
    %cst_25 = arith.constant dense<0.000000e+00> : vector<8x8xf32>
    %52 = tpu.matmul %47, %49, %cst_25 {dimension_numbers = #tpu.dot_dimension_numbers<[1], [1], [0], [0], [0, 0, 1, 0], [], []>} : vector<8x8xbf16>, vector<8x8xbf16>, vector<8x8xf32> -> vector<8x8xf32>
    %cst_26 = arith.constant dense<0xFF800000> : vector<8xf32>
    %53 = vector.multi_reduction <maximumf>, %52, %cst_26 [1] : vector<8x8xf32> to vector<8xf32>
    %54 = vector.shape_cast %53 : vector<8xf32> to vector<8x1xf32>
    %55 = vector.broadcast %54 : vector<8x1xf32> to vector<8x8xf32>
    %56 = arith.subf %52, %55 : vector<8x8xf32>
    %57 = math.exp %56 : vector<8x8xf32>
    %cst_27 = arith.constant dense<0.000000e+00> : vector<8xf32>
    %58 = vector.multi_reduction <add>, %57, %cst_27 [1] : vector<8x8xf32> to vector<8xf32>
    %59 = vector.shape_cast %58 : vector<8xf32> to vector<8x1xf32>
    %60 = tpu.reciprocal %59 {approx = true} : vector<8x1xf32> -> vector<8x1xf32>
    %61 = vector.broadcast %60 : vector<8x1xf32> to vector<8x8xf32>
    %62 = arith.mulf %57, %61 : vector<8x8xf32>
    %63 = arith.truncf %62 : vector<8x8xf32> to vector<8x8xbf16>
    %cst_28 = arith.constant dense<0.000000e+00> : vector<8x8xf32>
    %64 = tpu.matmul %63, %51, %cst_28 {dimension_numbers = #tpu.dot_dimension_numbers<[1], [0], [0], [1], [0, 0, 1, 1], [], []>} : vector<8x8xbf16>, vector<8x8xbf16>, vector<8x8xf32> -> vector<8x8xf32>
    %65 = vector.extract_strided_slice %15 {offsets = [8, 0], sizes = [8, 32], strides = [1, 1]} : vector<32x32xf32> to vector<8x32xf32>
    %66 = arith.truncf %65 : vector<8x32xf32> to vector<8x32xbf16>
    %67 = arith.truncf %64 : vector<8x8xf32> to vector<8x8xbf16>
    %cst_29 = arith.constant dense<0.000000e+00> : vector<8x32xf32>
    %68 = tpu.matmul %67, %66, %cst_29 {dimension_numbers = #tpu.dot_dimension_numbers<[1], [0], [0], [1], [0, 0, 1, 1], [], []>} : vector<8x8xbf16>, vector<8x32xbf16>, vector<8x32xf32> -> vector<8x32xf32>
    %69 = arith.addf %45, %68 : vector<8x32xf32>
    %70 = vector.extract_strided_slice %18 {offsets = [0, 16], sizes = [8, 8], strides = [1, 1]} : vector<8x32xf32> to vector<8x8xf32>
    %71 = arith.truncf %70 : vector<8x8xf32> to vector<8x8xbf16>
    %72 = vector.extract_strided_slice %19 {offsets = [0, 16], sizes = [8, 8], strides = [1, 1]} : vector<8x32xf32> to vector<8x8xf32>
    %73 = arith.truncf %72 : vector<8x8xf32> to vector<8x8xbf16>
    %74 = vector.extract_strided_slice %20 {offsets = [0, 16], sizes = [8, 8], strides = [1, 1]} : vector<8x32xf32> to vector<8x8xf32>
    %75 = arith.truncf %74 : vector<8x8xf32> to vector<8x8xbf16>
    %cst_30 = arith.constant dense<0.000000e+00> : vector<8x8xf32>
    %76 = tpu.matmul %71, %73, %cst_30 {dimension_numbers = #tpu.dot_dimension_numbers<[1], [1], [0], [0], [0, 0, 1, 0], [], []>} : vector<8x8xbf16>, vector<8x8xbf16>, vector<8x8xf32> -> vector<8x8xf32>
    %cst_31 = arith.constant dense<0xFF800000> : vector<8xf32>
    %77 = vector.multi_reduction <maximumf>, %76, %cst_31 [1] : vector<8x8xf32> to vector<8xf32>
    %78 = vector.shape_cast %77 : vector<8xf32> to vector<8x1xf32>
    %79 = vector.broadcast %78 : vector<8x1xf32> to vector<8x8xf32>
    %80 = arith.subf %76, %79 : vector<8x8xf32>
    %81 = math.exp %80 : vector<8x8xf32>
    %cst_32 = arith.constant dense<0.000000e+00> : vector<8xf32>
    %82 = vector.multi_reduction <add>, %81, %cst_32 [1] : vector<8x8xf32> to vector<8xf32>
    %83 = vector.shape_cast %82 : vector<8xf32> to vector<8x1xf32>
    %84 = tpu.reciprocal %83 {approx = true} : vector<8x1xf32> -> vector<8x1xf32>
    %85 = vector.broadcast %84 : vector<8x1xf32> to vector<8x8xf32>
    %86 = arith.mulf %81, %85 : vector<8x8xf32>
    %87 = arith.truncf %86 : vector<8x8xf32> to vector<8x8xbf16>
    %cst_33 = arith.constant dense<0.000000e+00> : vector<8x8xf32>
    %88 = tpu.matmul %87, %75, %cst_33 {dimension_numbers = #tpu.dot_dimension_numbers<[1], [0], [0], [1], [0, 0, 1, 1], [], []>} : vector<8x8xbf16>, vector<8x8xbf16>, vector<8x8xf32> -> vector<8x8xf32>
    %89 = vector.extract_strided_slice %15 {offsets = [16, 0], sizes = [8, 32], strides = [1, 1]} : vector<32x32xf32> to vector<8x32xf32>
    %90 = arith.truncf %89 : vector<8x32xf32> to vector<8x32xbf16>
    %91 = arith.truncf %88 : vector<8x8xf32> to vector<8x8xbf16>
    %cst_34 = arith.constant dense<0.000000e+00> : vector<8x32xf32>
    %92 = tpu.matmul %91, %90, %cst_34 {dimension_numbers = #tpu.dot_dimension_numbers<[1], [0], [0], [1], [0, 0, 1, 1], [], []>} : vector<8x8xbf16>, vector<8x32xbf16>, vector<8x32xf32> -> vector<8x32xf32>
    %93 = arith.addf %69, %92 : vector<8x32xf32>
    %94 = vector.extract_strided_slice %18 {offsets = [0, 24], sizes = [8, 8], strides = [1, 1]} : vector<8x32xf32> to vector<8x8xf32>
    %95 = arith.truncf %94 : vector<8x8xf32> to vector<8x8xbf16>
    %96 = vector.extract_strided_slice %19 {offsets = [0, 24], sizes = [8, 8], strides = [1, 1]} : vector<8x32xf32> to vector<8x8xf32>
    %97 = arith.truncf %96 : vector<8x8xf32> to vector<8x8xbf16>
    %98 = vector.extract_strided_slice %20 {offsets = [0, 24], sizes = [8, 8], strides = [1, 1]} : vector<8x32xf32> to vector<8x8xf32>
    %99 = arith.truncf %98 : vector<8x8xf32> to vector<8x8xbf16>
    %cst_35 = arith.constant dense<0.000000e+00> : vector<8x8xf32>
    %100 = tpu.matmul %95, %97, %cst_35 {dimension_numbers = #tpu.dot_dimension_numbers<[1], [1], [0], [0], [0, 0, 1, 0], [], []>} : vector<8x8xbf16>, vector<8x8xbf16>, vector<8x8xf32> -> vector<8x8xf32>
    %cst_36 = arith.constant dense<0xFF800000> : vector<8xf32>
    %101 = vector.multi_reduction <maximumf>, %100, %cst_36 [1] : vector<8x8xf32> to vector<8xf32>
    %102 = vector.shape_cast %101 : vector<8xf32> to vector<8x1xf32>
    %103 = vector.broadcast %102 : vector<8x1xf32> to vector<8x8xf32>
    %104 = arith.subf %100, %103 : vector<8x8xf32>
    %105 = math.exp %104 : vector<8x8xf32>
    %cst_37 = arith.constant dense<0.000000e+00> : vector<8xf32>
    %106 = vector.multi_reduction <add>, %105, %cst_37 [1] : vector<8x8xf32> to vector<8xf32>
    %107 = vector.shape_cast %106 : vector<8xf32> to vector<8x1xf32>
    %108 = tpu.reciprocal %107 {approx = true} : vector<8x1xf32> -> vector<8x1xf32>
    %109 = vector.broadcast %108 : vector<8x1xf32> to vector<8x8xf32>
    %110 = arith.mulf %105, %109 : vector<8x8xf32>
    %111 = arith.truncf %110 : vector<8x8xf32> to vector<8x8xbf16>
    %cst_38 = arith.constant dense<0.000000e+00> : vector<8x8xf32>
    %112 = tpu.matmul %111, %99, %cst_38 {dimension_numbers = #tpu.dot_dimension_numbers<[1], [0], [0], [1], [0, 0, 1, 1], [], []>} : vector<8x8xbf16>, vector<8x8xbf16>, vector<8x8xf32> -> vector<8x8xf32>
    %113 = vector.extract_strided_slice %15 {offsets = [24, 0], sizes = [8, 32], strides = [1, 1]} : vector<32x32xf32> to vector<8x32xf32>
    %114 = arith.truncf %113 : vector<8x32xf32> to vector<8x32xbf16>
    %115 = arith.truncf %112 : vector<8x8xf32> to vector<8x8xbf16>
    %cst_39 = arith.constant dense<0.000000e+00> : vector<8x32xf32>
    %116 = tpu.matmul %115, %114, %cst_39 {dimension_numbers = #tpu.dot_dimension_numbers<[1], [0], [0], [1], [0, 0, 1, 1], [], []>} : vector<8x8xbf16>, vector<8x32xbf16>, vector<8x32xf32> -> vector<8x32xf32>
    %117 = arith.addf %93, %116 : vector<8x32xf32>
    %c0_40 = arith.constant 0 : index
    %c0_41 = arith.constant 0 : index
    %c0_42 = arith.constant 0 : index
    %118 = vector.load %arg8[%c0_40, %c0_41, %c0_42] : memref<1x8x32xf32, #tpu.memory_space<vmem>>, vector<1x8x32xf32>
    %119 = vector.shape_cast %118 : vector<1x8x32xf32> to vector<8x32xf32>
    %120 = vector.shape_cast %117 : vector<8x32xf32> to vector<1x8x32xf32>
    tpu.vector_store %arg8[%c0_40, %c0_41, %c0_42], %120 {strides = array<i32>} : memref<1x8x32xf32, #tpu.memory_space<vmem>>, vector<1x8x32xf32>,
    return
  }
  func.func @transform_0(%arg0: i32) -> (i32, i32, i32) {
    %c0_i32 = arith.constant 0 : i32
    %c0_i32_0 = arith.constant 0 : i32
    %c0_i32_1 = arith.constant 0 : i32
    return %arg0, %c0_i32, %c0_i32_0 : i32, i32, i32
  }
  func.func @transform_1(%arg0: i32) -> (i32, i32, i32) {
    %c0_i32 = arith.constant 0 : i32
    %c0_i32_0 = arith.constant 0 : i32
    %c0_i32_1 = arith.constant 0 : i32
    return %arg0, %c0_i32, %c0_i32_0 : i32, i32, i32
  }
  func.func @transform_2(%arg0: i32) -> (i32, i32, i32) {
    %c0_i32 = arith.constant 0 : i32
    %c0_i32_0 = arith.constant 0 : i32
    %c0_i32_1 = arith.constant 0 : i32
    return %arg0, %c0_i32, %c0_i32_0 : i32, i32, i32
  }
  func.func @transform_3(%arg0: i32) -> (i32, i32) {
    %c0_i32 = arith.constant 0 : i32
    %c0_i32_0 = arith.constant 0 : i32
    %c0_i32_1 = arith.constant 0 : i32
    return %c0_i32, %c0_i32_0 : i32, i32
  }
  func.func @transform_4(%arg0: i32) -> (i32, i32) {
    %c0_i32 = arith.constant 0 : i32
    %c0_i32_0 = arith.constant 0 : i32
    %c0_i32_1 = arith.constant 0 : i32
    return %c0_i32, %c0_i32_0 : i32, i32
  }
  func.func @transform_5(%arg0: i32) -> (i32, i32) {
    %c0_i32 = arith.constant 0 : i32
    %c0_i32_0 = arith.constant 0 : i32
    %c0_i32_1 = arith.constant 0 : i32
    return %c0_i32, %c0_i32_0 : i32, i32
  }
  func.func @transform_6(%arg0: i32) -> (i32, i32) {
    %c0_i32 = arith.constant 0 : i32
    %c0_i32_0 = arith.constant 0 : i32
    %c0_i32_1 = arith.constant 0 : i32
    return %c0_i32, %c0_i32_0 : i32, i32
  }
  func.func @transform_7(%arg0: i32) -> (i32, i32, i32) {
    %c0_i32 = arith.constant 0 : i32
    %c0_i32_0 = arith.constant 0 : i32
    %c0_i32_1 = arith.constant 0 : i32
    return %arg0, %c0_i32, %c0_i32_0 : i32, i32, i32
  }
}

</mosaic_0001>

<bundles_post_ra>
// kernel: tpu_custom_call.1
= control target key start
LH: loop header
LB: loop body
LE: loop exit
PB: predicated region body
PF: predicated region fallthrough
CT: control target
= control target key end

     0   :  { %s1781_s0 = inlined_call_operand.hbm [shape: f32[2,8,32], index: 0, kind: input, shape index: {}]   ;;  %s1782_s1 = inlined_call_operand.hbm [shape: f32[2,8,32], index: 1, kind: input, shape index: {}]   ;;  %s1783_s2 = inlined_call_operand.hbm [shape: f32[2,8,32], index: 2, kind: input, shape index: {}]   ;;  %s1784_s3 = inlined_call_operand.hbm [shape: f32[32,32], index: 3, kind: input, shape index: {}]   ;;  %s1785_s4 = inlined_call_operand.hbm [shape: f32[32,32], index: 4, kind: input, shape index: {}]   ;;  %s1786_s5 = inlined_call_operand.hbm [shape: f32[32,32], index: 5, kind: input, shape index: {}]   ;;  %s1787_s6 = inlined_call_operand.hbm [shape: f32[32,32], index: 6, kind: input, shape index: {}]   ;;  %s1788_s7 = inlined_call_operand.hbm [shape: f32[2,8,32], index: 7, kind: output, shape index: {}]  }
   0x1   :  { %1797 = sst [smem:[#allocation22_spill]] %s1782_s1 }
   0x2   :  { %1798 = sst [smem:[#allocation23_spill]] %s1784_s3 }
   0x3   :  { %1799 = sst [smem:[#allocation24_spill]] %s1785_s4 }
   0x4   :  { %1800 = sst [smem:[#allocation25_spill]] %s1786_s5 }
   0x5   :  { %1801 = sst [smem:[#allocation26_spill]] %s1787_s6 }
   0x6   :  { %12 = vsyncpa [#allocation3], 0 }
   0x7   :  { %14 = vsyncpa [#allocation3 + $0x1], 0 }
   0x8   :  { %15 = vsyncpa [#allocation6], 0 }
   0x9   :  { %17 = vsyncpa [#allocation6 + $0x1], 0 }
   0xa   :  { %18 = vsyncpa [#allocation9], 0 }
   0xb   :  { %19 = vsyncpa [#allocation12], 0 }
   0xc   :  { %20 = vsyncpa [#allocation4], 0 }
   0xd   :  { %22 = vsyncpa [#allocation4 + $0x1], 0  ;;  %s1494_s24 = smov 0   ;;  %s1496_s25 = smov 0  }
   0xe   :  { %s1498_s26 = smov 0   ;;  %s1500_s27 = smov 0  }
   0xf LB: > { %s1802_s3 = sld [smem:[#allocation23_spill]]  ;;  %s1518_s8 = sadd.s32 4294967295, %s1443_s27   ;;  %s1443_s27 = sphi %s1500_s27, %s1823_s27   ;;  %s1439_s26 = sphi %s1498_s26, %s1827_s26   ;;  %s1435_s25 = sphi %s1496_s25, %s1826_s25   ;;  %s1431_s24 = sphi %s1494_s24, %s1825_s24  }
  0x10   : > { %p997_p0 = scmp.ge.s32.totalorder %s1443_s27, 1  ;;  %p1794_p1 = scmp.eq.s32.totalorder %s1518_s8, 0 }
  0x11   : > { %p221_p2 = scmp.lt.s32.totalorder %s1443_s27, 3  ;;  %s1445_s10 = smov [#allocation8]  }
  0x12   : > { %s234_s11 = sshll.u32 %s1445_s10, 4  ;;  %s1804_s5 = sld [smem:[#allocation25_spill]]  ;;  %s235_s11 = int_to_ptr.vmem [resolvable:$true] %s234_s11 }
  0x13   : > { %p1523_p3 = pnand %p997_p0, %p221_p2  ;;  %s1446_s16 = smov [#allocation11]  }
  0x14   : > { %s262_s17 = sshll.u32 %s1446_s16, 4  ;;  %s1789_s18 = smov 128   ;;  %s263_s17 = int_to_ptr.vmem [resolvable:$true] %s262_s17 }
  0x15   : > { %s232_s30 = sshll.u32 %s1802_s3, 4  ;;  %p1061_p4 = pneg %p1523_p3  ;;  %s233_s30 = int_to_ptr.hbm [resolvable:$true] %s232_s30 }
  0x16   : > { %s1791_s19 = smov 8   ;;  %s996_s20 = sadd.s32 4294967294, %s1443_s27  }
  0x17   : > { %p1535_p6 = pnand %p1061_p4, %p1794_p1  ;;  %s1551_s21 = sadd.s32 1, %s1443_s27  }
  0x18   : > { %s260_s14 = sshll.u32 %s1804_s5, 4  ;;  %1806 = sst [smem:[#allocation20_spill]] %s1551_s21  ;;  %s261_s14 = int_to_ptr.hbm [resolvable:$true] %s260_s14 }
  0x19   : > { %1064 = dma.hbm_to_vmem [thread:$0]  (!%p1535_p6), %s233_s30, 512, %s235_s11, [#allocation9], %s1789_s18, %s1789_s18, %s1791_s19  }
  0x1a   : > { %1070 = dma.hbm_to_vmem [thread:$0]  (!%p1535_p6), %s261_s14, 512, %s263_s17, [#allocation12], %s1789_s18, %s1789_s18, %s1791_s19  }
  0x1b   : > { %s32_s22 = ssub.s32 %s1443_s27, %s1551_s21  ;;  %s35_s23 = sadd.s32 1, %s1439_s26 }
  0x1c   : > { %p33_p7 = scmp.eq.s32.totalorder %s32_s22, 0  ;;  %p42_p8 = scmp.ne.s32.totalorder %s1439_s26, %s1435_s25 }
  0x1d   : > { %p43_p9 = scmp.eq.s32.totalorder %s1443_s27, 0  ;;  %p48_p10 = scmp.ne.s32.totalorder %s1435_s25, %s1431_s24 }
  0x1e   : > { %s1562_s28 = scalar_select %p33_p7, %s1439_s26, %s35_s23  }
  0x1f   : > { %p44_p11 = por %p43_p9, %p42_p8  ;;  %p1566_p12 = por %p1794_p1, %p48_p10 }
  0x20   : > { %1807 = sst [smem:[#allocation21_spill]] %s1562_s28  ;;  %p208_p13 = scmp.eq.s32.totalorder %s1518_s8, 1 }
  0x21   : > { %p214_p0 = scmp.eq.s32.totalorder %s996_s20, 1  ;;  %p1092_p2 = scmp.lt.s32.totalorder %s1443_s27, 2 }
  0x22   : > { %s1793_s30 = sand.u32 1, %s1439_s26   ;;  %p1573_p4 = por %p208_p13, %p42_p8 }
  0x23   : > { %p1577_p5 = por %p214_p0, %p48_p10  ;;  %s1583_s12 = sshll.u32 %s1793_s30, 3 }
  0x24   : > { %s1586_s13 = sshll.u32 %s1443_s27, 3  ;;  %p1588_p7 = pnand %p1092_p2, %p44_p11 }
  0x25   : > { %s309_s16 = sand.u32 1, %s1443_s27   ;;  %s1812_s1 = sld [smem:[#allocation22_spill]] }
  0x26   : > { %s313_s18 = scalar_lea.vmem [#allocation5], %s1583_s12  ;;  %s1598_s30 = scalar_lea.sflag [#allocation6], %s309_s16 }
  0x27   : > { %s321_s19 = sshll.u32 %s313_s18, 4  ;;  %p1219_p9 = pneg %p1588_p7  ;;  %s322_s19 = int_to_ptr.vmem [resolvable:$true] %s321_s19 }
  0x2b   : > { %s317_s22 = scalar_lea.hbm %s1812_s1, %s1586_s13  ;;  %s1222_s20 = scalar_lea.hbm %s1812_s1, 16 }
  0x2c   : > { %s319_s23 = sshll.u32 %s317_s22, 4  ;;  %s320_s23 = int_to_ptr.hbm [resolvable:$true] %s319_s23 }
  0x2d   : > { %s1215_s3 = sshra.s32 %s320_s23, 4  ;;  %s1216_s3 = int_to_ptr.hbm [resolvable:$true] %s1215_s3 }
  0x2e   : > { %s1217_s5 = scalar_lea.hbm %s1216_s3, 8  ;;  %p1223_p13 = scmp.lt.s32.totalorder %s1216_s3, %s1812_s1 }
  0x2f   : > { %p1218_p8 = scmp.ne.s32.totalorder %s1216_s3, %s1217_s5  ;;  %p1224_p0 = scmp.lt.s32.totalorder %s1222_s20, %s1217_s5 }
  0x31   : > { %p1220_p10 = pnand %p1219_p9, %p1218_p8  ;;  %p1225_p2 = por %p1224_p0, %p1223_p13 }
  0x33   : > { %p1221_p11 = pneg %p1220_p10 }
  0x35   : > { %p1226_p1 = pnand %p1225_p2, %p1221_p11 }
  0x37   : > { %1229 = shalt.err (!%p1226_p1)
}
  0x38   : > { %1080 = dma.hbm_to_vmem [thread:$0]  (!%p1588_p7), %s320_s23, 128, %s322_s19, %s1598_s30  }
  0x39   : > { %s1813_s4 = sld [smem:[#allocation24_spill]]  ;;  %s1449_s17 = smov [#allocation10]  }
  0x3a   : > { %s248_s3 = sshll.u32 %s1449_s17, 4  ;;  %s1814_s6 = sld [smem:[#allocation26_spill]]  ;;  %s249_s3 = int_to_ptr.vmem [resolvable:$true] %s248_s3 }
  0x3b   : > { %s1815_s18 = smov 8   ;;  %s1816_s1 = smov 128  }
  0x3c   : > { %s1450_s19 = smov [#allocation13]   ;;  %s298_s17 = scalar_lea.hbm %s1781_s0, %s1586_s13 }
  0x3d   : > { %s276_s23 = sshll.u32 %s1450_s19, 4  ;;  %s294_s5 = scalar_lea.vmem [#allocation2], %s1583_s12  ;;  %s277_s23 = int_to_ptr.vmem [resolvable:$true] %s276_s23 }
  0x3e   : > { %s302_s20 = sshll.u32 %s294_s5, 4  ;;  %s303_s20 = int_to_ptr.vmem [resolvable:$true] %s302_s20 }
  0x3f   : > { %s246_s28 = sshll.u32 %s1813_s4, 4  ;;  %s300_s4 = sshll.u32 %s298_s17, 4  ;;  %s247_s28 = int_to_ptr.hbm [resolvable:$true] %s246_s28  ;;  %s301_s4 = int_to_ptr.hbm [resolvable:$true] %s300_s4 }
  0x40   : > { %s274_s22 = sshll.u32 %s1814_s6, 4  ;;  %s1305_s6 = sshra.s32 %s301_s4, 4  ;;  %s275_s22 = int_to_ptr.hbm [resolvable:$true] %s274_s22  ;;  %s1306_s6 = int_to_ptr.hbm [resolvable:$true] %s1305_s6 }
  0x41   : > { %1067 = dma.hbm_to_vmem [thread:$0]  (!%p1535_p6), %s247_s28, 512, %s249_s3, [#allocation9], %s1816_s1, %s1816_s1, %s1815_s18  }
  0x42   : > { %1073 = dma.hbm_to_vmem [thread:$0]  (!%p1535_p6), %s275_s22, 512, %s277_s23, [#allocation12], %s1816_s1, %s1816_s1, %s1815_s18  }
  0x43   : > { %s1817_s28 = sand.u32 1, %s1439_s26   ;;  %s1307_s19 = scalar_lea.hbm %s1306_s6, 8 }
  0x44   : > { %s291_s3 = scalar_lea.sflag [#allocation3], %s1817_s28  ;;  %p1308_p1 = scmp.ne.s32.totalorder %s1306_s6, %s1307_s19 }
  0x45   : > { %s1312_s22 = scalar_lea.hbm %s1781_s0, 16  ;;  %p1313_p6 = scmp.lt.s32.totalorder %s1306_s6, %s1781_s0 }
  0x46   : > { %p1310_p8 = pnand %p1308_p1, %p1219_p9  ;;  %p1314_p11 = scmp.lt.s32.totalorder %s1312_s22, %s1307_s19 }
  0x48   : > { %p1311_p10 = pneg %p1310_p8  ;;  %p1315_p13 = por %p1314_p11, %p1313_p6 }
  0x4a   : > { %p1316_p0 = pnand %p1315_p13, %p1311_p10 }
  0x4c   : > { %1319 = shalt.err (!%p1316_p0)
}
  0x4d   : > { %1077 = dma.hbm_to_vmem [thread:$0]  (!%p1588_p7), %s301_s4, 128, %s303_s20, %s291_s3  }
  0x4e   : > { %s336_s17 = scalar_lea.hbm %s1783_s2, %s1586_s13  ;;  %s332_s5 = scalar_lea.vmem [#allocation7], %s1583_s12 }
  0x4f   : > { %s340_s28 = sshll.u32 %s332_s5, 4  ;;  %s338_s1 = sshll.u32 %s336_s17, 4  ;;  %s341_s28 = int_to_ptr.vmem [resolvable:$true] %s340_s28  ;;  %s339_s1 = int_to_ptr.hbm [resolvable:$true] %s338_s1 }
  0x50   : > { %s1335_s6 = sshra.s32 %s339_s1, 4  ;;  %s1342_s4 = scalar_lea.hbm %s1783_s2, 16  ;;  %s1336_s6 = int_to_ptr.hbm [resolvable:$true] %s1335_s6 }
  0x51   : > { %s1337_s19 = scalar_lea.hbm %s1336_s6, 8  ;;  %p1343_p10 = scmp.lt.s32.totalorder %s1336_s6, %s1783_s2 }
  0x52   : > { %p1338_p2 = scmp.ne.s32.totalorder %s1336_s6, %s1337_s19  ;;  %p1344_p6 = scmp.lt.s32.totalorder %s1342_s4, %s1337_s19 }
  0x54   : > { %p1340_p1 = pnand %p1338_p2, %p1219_p9  ;;  %p1345_p11 = por %p1344_p6, %p1343_p10 }
  0x56   : > { %p1341_p8 = pneg %p1340_p1 }
  0x58   : > { %p1346_p13 = pnand %p1345_p11, %p1341_p8 }
  0x5a   : > { %1349 = shalt.err (!%p1346_p13)
}
  0x5b   : > { %1083 = dma.hbm_to_vmem [thread:$0]  (!%p1588_p7), %s339_s1, 128, %s341_s28, %s1598_s30  }
  0x5c   : > { %349 = sbr.rel (%p1523_p3) target bundleno = 1454 (0x5ae), region = 48  ;;  %s1668_s12 = sand.u32 (!%p1523_p3), 1, %s1435_s25  }
  0x5d   : > { %s1671_s13 = sshll.u32 (!%p1523_p3), %s1668_s12, 3  ;;  %s352_s18 = scalar_lea.sflag (!%p1523_p3), [#allocation3], %s1668_s12 }
  0x5e   : > { %s355_s23 = scalar_lea.vmem (!%p1523_p3), [#allocation2], %s1671_s13 }
  0x61   : > { %1410 = dma.done.wait (%p1566_p12), %s352_s18, 128  }
  0x62   : > { %1412 = vsyncadd (%p1566_p12), %s352_s18, 4294967168  ;;  %s361_s9 = sand.u32 1, %s1518_s8   ;;  %s365_s14 = scalar_lea.vmem [#allocation5], %s1671_s13 }
  0x63   : > { %s362_s30 = scalar_lea.sflag [#allocation6], %s361_s9 }
  0x64   : > { %1414 = dma.done.wait (%p1566_p12), %s362_s30, 256  }
  0x65   : > { %1416 = vsyncadd (%p1566_p12), %s362_s30, 4294967040  ;;  %s375_s21 = scalar_lea.vmem [#allocation7], %s1671_s13  ;;  %p1818_p3 = scmp.eq.s32.totalorder %s1518_s8, 0 }
  0x67   : > { %1418 = dma.done.wait (%p1818_p3), [#allocation9], 1024   ;;  %p1819_p7 = pmov %p1818_p3 }
  0x68   : > { %p1820_p9 = pmov %p1818_p3 }
  0x69   : > { %1420 = vsyncadd (%p1819_p7), [#allocation9], 4294966272 }
  0x6a   : > { %1422 = dma.done.wait (%p1820_p9), [#allocation12], 1024   ;;  %p1821_p0 = pmov %p1818_p3 }
  0x6b   : > { %v446_v0 = vld [vmem:[#allocation8 + $0x10] sm:$0xff]  ;;  %v447_v1 = vld [vmem:[#allocation8 + $0x18] sm:$0xff]  ;;  %v444_v5 = vld [vmem:[#allocation8] sm:$0xff]  ;;  %vm466_vm0 = vcmask 261120   ;;  %vm519_vm1 = vcmask 64512   ;;  %s1451_s29 = smov 112  }
  0x6c   : > { %1424 = vsyncadd (%p1821_p0), [#allocation12], 4294966272  ;;  %v452_v2 = vld [vmem:[#allocation10 + $0x10] sm:$0xff]  ;;  %v449_v3 = vpack.c.bf16 %v447_v1, %v446_v0  ;;  %v453_v4 = vld [vmem:[#allocation10 + $0x18] sm:$0xff]  ;;  %s1452_s16 = smov 120   ;;  %s1453_s17 = smov 104  }
  0x6d   : > { %v445_v6 = vld [vmem:[#allocation8 + $0x8] sm:$0xff]  ;;  %v455_v7 = vpack.c.bf16 %v453_v4, %v452_v2  ;;  %v450_v8 = vld [vmem:[#allocation10] sm:$0xff]  ;;  %v438_v11 = vld [vmem:[%s355_s23] sm:$0xff]  ;;  %vm554_vm2 = vcmask 1043456   ;;  %s1034_s5 = sshll.u32 %s1518_s8, 3  ;;  %s436_s19 = scalar_lea.vmem [#allocation14], %s1671_s13 }
  0x6e   : > { %v451_v9 = vld [vmem:[#allocation10 + $0x8] sm:$0xff]  ;;  %476 = vmatpush.bf16.msra.mxu0 %v449_v3  ;;  %v448_v10 = vpack.c.bf16 %v445_v6, %v444_v5  ;;  %v439_v14 = vpack.c.bf16 %v438_v11, %v438_v11  ;;  %v458_v28 = vld [vmem:[#allocation11 + $0x10] sm:$0xff]  ;;  %v459_v29 = vld [vmem:[#allocation11 + $0x18] sm:$0xff]  ;;  %s840_s6 = scalar_lea.hbm %s1788_s7, %s1034_s5  ;;  %s842_s15 = sshll.u32 %s436_s19, 4  ;;  %s843_s15 = int_to_ptr.vmem [resolvable:$true] %s842_s15 }
  0x6f   : > { %493 = vmatpush.bf16.msra.mxu1 %v455_v7  ;;  %v454_v12 = vpack.c.bf16 %v451_v9, %v450_v8  ;;  %v440_v13 = vld [vmem:[%s365_s14] sm:$0xff]  ;;  %v461_v31 = vpack.c.bf16 %v459_v29, %v458_v28  ;;  %v442_v38 = vld [vmem:[%s375_s21] sm:$0xff]  ;;  %s844_s22 = sshll.u32 %s840_s6, 4  ;;  %s830_s4 = scalar_lea.sflag [#allocation4], %s1668_s12  ;;  %s845_s22 = int_to_ptr.hbm [resolvable:$true] %s844_s22 }
  0x70   : > { %v441_v15 = vpack.c.bf16 %v440_v13, %v440_v13  ;;  %v456_v30 = vld [vmem:[#allocation11] sm:$0xff]  ;;  %v457_v32 = vld [vmem:[#allocation11 + $0x8] sm:$0xff]  ;;  %v443_v39 = vpack.c.bf16 %v442_v38, %v442_v38  ;;  %s1379_s20 = sshra.s32 %s845_s22, 4  ;;  %s1385_s13 = scalar_lea.hbm %s1788_s7, 16  ;;  %s1380_s20 = int_to_ptr.hbm [resolvable:$true] %s1379_s20 }
  0x71   : > { %509 = vmatpush.bf16.msra.mxu2 %v461_v31  ;;  %v460_v33 = vpack.c.bf16 %v457_v32, %v456_v30  ;;  %v462_v53 = vld [vmem:[#allocation13] sm:$0xff]  ;;  %s1381_s3 = scalar_lea.hbm %s1380_s20, 8  ;;  %p1386_p8 = scmp.lt.s32.totalorder %s1380_s20, %s1788_s7 }
  0x72   : > { %477 = vmatpush.bf16.msra.mxu0 %v448_v10  ;;  %v571_v54 = vpack.c.bf16 %v462_v53, %v462_v53  ;;  %p1382_p12 = scmp.ne.s32.totalorder %s1380_s20, %s1381_s3  ;;  %p1387_p10 = scmp.lt.s32.totalorder %s1385_s13, %s1381_s3 }
  0x73   : > { %494 = vmatpush.bf16.msra.mxu1 %v454_v12 }
  0x74   : > { %v657_v55 = vsel %vm554_vm2, %v571_v54, 0  ;;  %p1383_p2 = pnand %p1382_p12, %p1573_p4  ;;  %p1388_p6 = por %p1387_p10, %p1386_p8 }
  0x75   : > { %1018 = vmatmul.msk.bf16.vlgmr.msra.gmra.mxu0 %vm466_vm0, %v439_v14  ;;  %510 = vmatpush.bf16.msra.mxu2 %v460_v33 }
  0x76   : > { %1019 = vmatmul.msk.bf16.vlgmr.msra.gmra.mxu1 %vm466_vm0, %v441_v15  ;;  %p1384_p1 = pneg %p1383_p2 }
  0x78   : > { %1020 = vmatmul.msk.bf16.vlgmr.msra.gmra.mxu2 %vm466_vm0, %v443_v39  ;;  %p1389_p11 = pnand %p1388_p6, %p1384_p1 }
  0xf2   : > { %v479_v16 = vpop.f32.mrf.mxu0 }
  0xf3   : > { %v496_v17 = vpop.f32.mrf.mxu1  ;;  %v483_v19 = vmul.f32 0.17677669, %v479_v16  ;;  %v463_v16 = vld [vmem:[#allocation13 + $0x8] sm:$0xff] }
  0xf4   : > { %v517_v18 = vpack.c.bf16 %v496_v17, %v496_v17  ;;  %v632_v17 = vpack.c.bf16 %v463_v16, %v463_v16 }
  0xf5   : > { %v516_v21 = vpack.c.bf16 %v483_v19, %v483_v19 }
  0xf6   : > { %674 = vrot.lane.b32.xlu2 %v517_v18, %s1451_s29  ;;  %577 = vrot.lane.b32.xlu1 %v517_v18, %s1452_s16  ;;  %v524_v20 = vsel %vm519_vm1, %v517_v18, 0 }
  0xf7   : > { %533 = vmatpush.bf16.xpose.msra.mxu3 %v524_v20 }
  0xfa   : > { %v481_v22 = vpop.f32.mrf.mxu0 }
  0xfb   : > { %v498_v23 = vpop.f32.mrf.mxu1  ;;  %v512_v48 = vpop.f32.mrf.mxu2 }
  0xfc   : > { %v1713_v49 = vpack.c.bf16 %v512_v48, %v512_v48 }
  0xfe   : > { %752 = vrot.lane.b32.xlu2 %v517_v18, %s1453_s17  ;;  %574 = vrot.lane.b32.xlu1 %v516_v21, %s1452_s16  ;;  %v556_v52 = vsel %vm554_vm2, %v1713_v49, 0  ;;  %v638_v18 = vsel %vm554_vm2, %v632_v17, 0 }
  0xff   : > { %1021 = vmatmul.msk.bf16.vlgmr.msra.gmra.mxu3 %vm519_vm1, %v516_v21  ;;  %565 = vmatpush.bf16.msrb.mxu0 %v556_v52 }
 0x100   : > { %647 = vmatpush.bf16.msrb.mxu3 %v638_v18 }
 0x103   : > { %v514_v51 = vpop.f32.mrf.mxu2  ;;  %666 = vmatpush.bf16.msra.mxu0 %v657_v55 }
 0x106   : > { %750 = vrot.lane.b32.xlu1 %v516_v21, %s1453_s17 }
 0x150   : > { %v675_v24 = vpop.permute.xlu2 %674 }
 0x151   : > { %v680_v27 = vsel %vm519_vm1, %v675_v24, 0 }
 0x158   : > { %v753_v50 = vpop.permute.xlu2 %752 }
 0x159   : > { %v758_v1 = vsel %vm519_vm1, %v753_v50, 0 }
 0x168   : > { %v578_v25 = vpop.permute.xlu1 %577 }
 0x169   : > { %v583_v26 = vsel %vm519_vm1, %v578_v25, 0 }
 0x16a   : > { %592 = vmatpush.bf16.xpose.msrb.mxu1 %v583_v26 }
 0x170   : > { %v575_v34 = vpop.permute.xlu1 %574 }
 0x171   : > { %1023 = vmatmul.msk.bf16.vlgmr.msrb.gmra.mxu1 %vm519_vm1, %v575_v34 }
 0x172   : > { %689 = vmatpush.bf16.xpose.msra.mxu1 %v680_v27 }
 0x178   : > { %v751_v15 = vpop.permute.xlu1 %750 }
 0x182   : > { %v535_v35 = vpop.f32.mrf.mxu3 }
 0x183   : > { %v539_v36 = vsel %vm519_vm1, %v535_v35, -inf }
 0x184   : > { %540 = vmax.xlane.f32.xlu0 %v539_v36 }
 0x18a   : > { %v537_v37 = vpop.f32.mrf.mxu3 }
 0x1ee   : > { %v594_v40 = vpop.f32.mrf.mxu1 }
 0x1ef   : > { %v598_v41 = vsel %vm519_vm1, %v594_v40, -inf }
 0x1f0   : > { %599 = vmax.xlane.f32.xlu2 %v598_v41 }
 0x1f6   : > { %v596_v42 = vpop.f32.mrf.mxu1 }
 0x1f7   : > { %v541_v43 = vpop.xlane.xlu0 %540 }
 0x1f8   : > { %v542_v44 = vsub.f32 %v535_v35, %v541_v43 }
 0x1fa   : > { %v543_v45 = vmul.f32 1.442695, %v542_v44 }
 0x1fc   : > { %1139 = vpow2.f32 %v543_v45  ;;  %v464_v45 = vld [vmem:[#allocation13 + $0x10] sm:$0xff] }
 0x202   : > { %v1140_v46 = vpop.eup %1139 }
 0x203   : > { %v545_v47 = vsel %vm519_vm1, %v1140_v46, 0.0 }
 0x204   : > { %546 = vadd.xlane.f32.xlu0 %v545_v47 }
 0x218   : > { %672 = vrot.lane.b32.xlu0 %v516_v21, %s1451_s29 }
 0x263   : > { %v600_v56 = vpop.xlane.xlu2 %599 }
 0x264   : > { %v601_v57 = vsub.f32 %v594_v40, %v600_v56 }
 0x266   : > { %v602_v58 = vmul.f32 1.442695, %v601_v57  ;;  %v465_v57 = vld [vmem:[#allocation13 + $0x18] sm:$0xff] }
 0x268   : > { %1141 = vpow2.f32 %v602_v58  ;;  %v806_v58 = vpack.c.bf16 %v465_v57, %v465_v57 }
 0x26e   : > { %v1142_v59 = vpop.eup %1141 }
 0x26f   : > { %v604_v60 = vsel %vm519_vm1, %v1142_v59, 0.0 }
 0x270   : > { %605 = vadd.xlane.f32.xlu2 %v604_v60 }
 0x277   : > { %v547_v61 = vpop.xlane.xlu0 %546 }
 0x278   : > { %1143 = vrcp.f32 %v547_v61 }
 0x27e   : > { %v1144_v62 = vpop.eup %1143 }
 0x27f   : > { %v549_v63 = vmul.f32 %v1144_v62, %v1140_v46  ;;  %v728_v46 = vpack.c.bf16 %v464_v45, %v464_v45 }
 0x281   : > { %v550_v0 = vpack.c.bf16 %v549_v63, %v549_v63  ;;  %v734_v47 = vsel %vm554_vm2, %v728_v46, 0 }
 0x282   : > { %743 = vmatpush.bf16.msra.mxu3 %v734_v47 }
 0x283   : > { %1022 = vmatmul.msk.bf16.vlgmr.msrb.gmra.mxu0 %vm519_vm1, %v550_v0 }
 0x284   : > { %767 = vmatpush.bf16.xpose.msrb.mxu0 %v758_v1 }
 0x288   : > { %611 = vrot.lane.b32.xlu2 %v1713_v49, %s1452_s16 }
 0x28a   : > { %v673_v2 = vpop.permute.xlu0 %672 }
 0x28b   : > { %1027 = vmatmul.msk.bf16.vlgmr.msra.gmra.mxu1 %vm519_vm1, %v673_v2 }
 0x2e3   : > { %v606_v3 = vpop.xlane.xlu2 %605 }
 0x2e4   : > { %1145 = vrcp.f32 %v606_v3 }
 0x2ea   : > { %v1146_v4 = vpop.eup %1145 }
 0x2eb   : > { %v608_v5 = vmul.f32 %v1146_v4, %v1142_v59  ;;  %v612_v6 = vpop.permute.xlu2 %611  ;;  %v812_v59 = vsel %vm554_vm2, %v806_v58, 0 }
 0x2ec   : > { %v617_v7 = vsel %vm554_vm2, %v612_v6, 0 }
 0x2ed   : > { %626 = vmatpush.bf16.msrb.mxu2 %v617_v7  ;;  %v609_v8 = vpack.c.bf16 %v608_v5, %v608_v5 }
 0x2f0   : > { %1024 = vmatmul.msk.bf16.vlgmr.msrb.gmra.mxu2 %vm519_vm1, %v609_v8 }
 0x300   : > { %v567_v9 = vpop.f32.mrf.mxu0 }
 0x301   : > { %v572_v10 = vpack.c.bf16 %v567_v9, %v567_v9 }
 0x303   : > { %1026 = vmatmul.msk.bf16.vlgmr.msra.gmra.mxu0 %vm519_vm1, %v572_v10 }
 0x308   : > { %v569_v11 = vpop.f32.mrf.mxu0  ;;  %v691_v12 = vpop.f32.mrf.mxu1 }
 0x309   : > { %v695_v13 = vsel %vm519_vm1, %v691_v12, -inf }
 0x30a   : > { %696 = vmax.xlane.f32.xlu1 %v695_v13 }
 0x310   : > { %v693_v14 = vpop.f32.mrf.mxu1 }
 0x313   : > { %1030 = vmatmul.msk.bf16.vlgmr.msrb.gmra.mxu0 %vm519_vm1, %v751_v15 }
 0x373   : > { %v628_v19 = vpop.f32.mrf.mxu2 }
 0x374   : > { %v633_v20 = vpack.c.bf16 %v628_v19, %v628_v19 }
 0x376   : > { %1025 = vmatmul.msk.bf16.vlgmr.msrb.gmra.mxu3 %vm519_vm1, %v633_v20 }
 0x37b   : > { %v630_v21 = vpop.f32.mrf.mxu2 }
 0x37d   : > { %v697_v22 = vpop.xlane.xlu1 %696 }
 0x37e   : > { %v698_v23 = vsub.f32 %v691_v12, %v697_v22 }
 0x380   : > { %v699_v24 = vmul.f32 1.442695, %v698_v23  ;;  %v668_v25 = vpop.f32.mrf.mxu0 }
 0x382   : > { %1147 = vpow2.f32 %v699_v24 }
 0x388   : > { %v1148_v26 = vpop.eup %1147  ;;  %v670_v27 = vpop.f32.mrf.mxu0 }
 0x389   : > { %v701_v28 = vsel %vm519_vm1, %v1148_v26, 0.0 }
 0x38a   : > { %702 = vadd.xlane.f32.xlu1 %v701_v28 }
 0x390   : > { %v769_v29 = vpop.f32.mrf.mxu0 }
 0x391   : > { %v773_v30 = vsel %vm519_vm1, %v769_v29, -inf }
 0x392   : > { %774 = vmax.xlane.f32.xlu0 %v773_v30 }
 0x398   : > { %v771_v31 = vpop.f32.mrf.mxu0 }
 0x3a6   : > { %707 = vrot.lane.b32.xlu0 %v1713_v49, %s1451_s29 }
 0x3f9   : > { %v649_v32 = vpop.f32.mrf.mxu3 }
 0x3fa   : > { %v669_v62 = vadd.f32 %v668_v25, %v649_v32 }
 0x3fd   : > { %v703_v37 = vpop.xlane.xlu1 %702 }
 0x401   : > { %v651_v33 = vpop.f32.mrf.mxu3 }
 0x405   : > { %v775_v34 = vpop.xlane.xlu0 %774 }
 0x406   : > { %v776_v35 = vsub.f32 %v769_v29, %v775_v34 }
 0x408   : > { %v777_v36 = vmul.f32 1.442695, %v776_v35 }
 0x40a   : > { %1149 = vpow2.f32 %v777_v36 }
 0x40b   : > { %1151 = vrcp.f32 %v703_v37 }
 0x410   : > { %v1150_v38 = vpop.eup %1149 }
 0x411   : > { %v779_v39 = vsel %vm519_vm1, %v1150_v38, 0.0  ;;  %v1152_v40 = vpop.eup %1151 }
 0x412   : > { %780 = vadd.xlane.f32.xlu1 %v779_v39  ;;  %v705_v41 = vmul.f32 %v1152_v40, %v1148_v26 }
 0x414   : > { %v706_v44 = vpack.c.bf16 %v705_v41, %v705_v41 }
 0x418   : > { %v708_v42 = vpop.permute.xlu0 %707 }
 0x419   : > { %v713_v43 = vsel %vm554_vm2, %v708_v42, 0 }
 0x41a   : > { %722 = vmatpush.bf16.msra.mxu2 %v713_v43 }
 0x41d   : > { %1028 = vmatmul.msk.bf16.vlgmr.msra.gmra.mxu2 %vm519_vm1, %v706_v44 }
 0x41e   : > { %821 = vmatpush.bf16.msrb.mxu2 %v812_v59 }
 0x42b   : > { %785 = vrot.lane.b32.xlu1 %v1713_v49, %s1453_s17 }
 0x485   : > { %v781_v48 = vpop.xlane.xlu1 %780 }
 0x486   : > { %1153 = vrcp.f32 %v781_v48 }
 0x48c   : > { %v1154_v50 = vpop.eup %1153 }
 0x48d   : > { %v783_v51 = vmul.f32 %v1154_v50, %v1150_v38 }
 0x48f   : > { %v784_v54 = vpack.c.bf16 %v783_v51, %v783_v51 }
 0x49d   : > { %v786_v52 = vpop.permute.xlu1 %785 }
 0x49e   : > { %v791_v53 = vsel %vm554_vm2, %v786_v52, 0 }
 0x49f   : > { %800 = vmatpush.bf16.msrb.mxu1 %v791_v53 }
 0x4a0   : > { %v724_v55 = vpop.f32.mrf.mxu2 }
 0x4a1   : > { %v729_v56 = vpack.c.bf16 %v724_v55, %v724_v55 }
 0x4a2   : > { %1031 = vmatmul.msk.bf16.vlgmr.msrb.gmra.mxu1 %vm519_vm1, %v784_v54 }
 0x4a3   : > { %1029 = vmatmul.msk.bf16.vlgmr.msra.gmra.mxu3 %vm519_vm1, %v729_v56 }
 0x4a8   : > { %v726_v49 = vpop.f32.mrf.mxu2 }
 0x51f   : > { %v802_v60 = vpop.f32.mrf.mxu1 }
 0x520   : > { %v807_v61 = vpack.c.bf16 %v802_v60, %v802_v60 }
 0x522   : > { %1032 = vmatmul.msk.bf16.vlgmr.msrb.gmra.mxu2 %vm519_vm1, %v807_v61 }
 0x526   : > { %v745_v63 = vpop.f32.mrf.mxu3 }
 0x527   : > { %v749_v0 = vadd.f32 %v745_v63, %v669_v62  ;;  %v804_v1 = vpop.f32.mrf.mxu1 }
 0x52e   : > { %v747_v2 = vpop.f32.mrf.mxu3 }
 0x5a5   : > { %v823_v3 = vpop.f32.mrf.mxu2 }
 0x5a6   : > { %v827_v4 = vadd.f32 %v823_v3, %v749_v0 }
 0x5a8   : > { %828 = vst.msk [vmem:[%s436_s19] sm:$0xff] %vm466_vm0, %v827_v4 }
 0x5a9   : > { %1392 = shalt.err (!%p1389_p11)
}
 0x5aa   : > { %1059 = dma.vmem_to_hbm [thread:$0]  (%p1573_p4), %s843_s15, 128, %s845_s22, %s830_s4  }
 0x5ad   : > { %v825_v5 = vpop.f32.mrf.mxu2 }
 0x5ae PF: > { %s856_s12 = sand.u32 1, %s1431_s24   ;;  %p1822_p13 = scmp.ge.s32.totalorder %s1443_s27, 2 }
 0x5af   : > { %s857_s30 = scalar_lea.sflag [#allocation4], %s856_s12 }
 0x5b0   : > { %p1085_p3 = pnand %p1822_p13, %p1577_p5 }
 0x5b2   : > { %p1086_p7 = pneg %p1085_p3 }
 0x5b4   : > { %1426 = dma.done.wait (%p1086_p7), %s857_s30, 128  }
 0x5b5   : > { %1428 = vsyncadd (%p1086_p7), %s857_s30, 4294967168  ;;  %s1823_s27 = sld [smem:[#allocation20_spill]]  ;;  %s1825_s24 = smov %s1435_s25 }
 0x5b6   : > { %s1824_s14 = sld [smem:[#allocation21_spill]]  ;;  %s1826_s25 = smov %s1439_s26 }
 0x5bb   : > { %p25_p9 = scmp.ge.s32.totalorder %s1823_s27, 4  }
 0x5bc   : > { %s1827_s26 = smov %s1824_s14 }
 0x5bd   :  { %27 = sbr.rel (!%p25_p9) target bundleno = 15 (0xf), region = 133 }
 0x5c2   :  { %863 = vsyncpa [#allocation3], 1 }
 0x5c3   :  { %865 = vsyncpa [#allocation3 + $0x1], 1 }
 0x5c4   :  { %866 = vsyncpa [#allocation6], 1 }
 0x5c5   :  { %868 = vsyncpa [#allocation6 + $0x1], 1 }
 0x5c6   :  { %869 = vsyncpa [#allocation9], 1 }
 0x5c7   :  { %870 = vsyncpa [#allocation12], 1 }
 0x5c8   :  { %871 = vsyncpa [#allocation4], 1 }
 0x5c9   :  { %873 = vsyncpa [#allocation4 + $0x1], 1 }

</bundles_post_ra>
